<compile_context>
chip_gen: v7x
topology: tpu7x:2x2x1
jax: 0.10.0
libtpu: 0.0.40
codegen_flags: <defaults>
</compile_context>

<pallas_src>
import jax
import jax.numpy as jnp
from jax import lax
from jax.experimental import pallas as pl
from jax.experimental.pallas import tpu as pltpu

EPS = 1e-5

# Set to jnp.bfloat16 on v6e/v7x to feed the MXU at full rate (accumulation
# stays f32 via preferred_element_type); f32 keeps exact parity with the ref.
MXU_DTYPE = jnp.float32


def _dot(a, b):
    return jnp.dot(a.astype(MXU_DTYPE), b.astype(MXU_DTYPE),
                   preferred_element_type=jnp.float32)


# --------------------------------------------------------------------------
# Kernels
# --------------------------------------------------------------------------
def _first_conv_kernel(x_ref, wb_ref, b_ref, sh_ref, o_ref):
    # x_ref : (1, H, W*Cin)      image rows, lane axis = (col, channel)
    # wb_ref: (3, W*Cin, W*Cout) banded conv weights, one per vertical tap
    # b_ref : (1, W*Cout)        bias tiled over columns
    # sh_ref: (2, H, H)          [sub-diagonal, super-diagonal] row shifters
    # o_ref : (1, H, W*Cout)
    x = x_ref[0]
    x_dn = _dot(sh_ref[0], x)   # x_dn[i] = x[i-1]  (zero row at i = 0)
    x_up = _dot(sh_ref[1], x)   # x_up[i] = x[i+1]  (zero row at i = H-1)
    out = _dot(x_dn, wb_ref[0]) + _dot(x, wb_ref[1]) + _dot(x_up, wb_ref[2])
    o_ref[0] = out + b_ref[0]


def _module_kernel(x_ref, ah_ref, bw_ref, sh_ref, scale_ref, shift_ref,
                   wb_ref, o_ref):
    # Fused: bilinear resize + the whole f3 residual chain for one image.
    # x_ref    : (1, Hin, Win*C)
    # ah_ref   : (Hout, Hin)             H-resize matrix
    # bw_ref   : (Win*C, Wout*C)         W-resize matrix  (kron(Aw^T, I_C))
    # sh_ref   : (2, Hout, Hout)         row-shift matrices
    # scale_ref: (L, Wout*C)             folded-BN scale, tiled over columns
    # shift_ref: (L, Wout*C)             folded-BN shift, tiled over columns
    # wb_ref   : (L, 3, Wout*C, Wout*C)  banded conv weights per layer
    # o_ref    : (1, Hout, Wout*C)
    act = _dot(_dot(ah_ref[...], x_ref[0]), bw_ref[...])   # resized activation
    sdn = sh_ref[0]
    sup = sh_ref[1]
    num_layers = scale_ref.shape[0]

    def conv3x3(y, l):
        y_dn = _dot(sdn, y)
        y_up = _dot(sup, y)
        return (_dot(y_dn, wb_ref[l, 0]) + _dot(y, wb_ref[l, 1])
                + _dot(y_up, wb_ref[l, 2]))

    for r in range(num_layers // 2):          # residual_2d_module blocks
        skip = act
        y = jnp.maximum(act * scale_ref[2 * r] + shift_ref[2 * r], 0.0)
        h = conv3x3(y, 2 * r)
        y = jnp.maximum(h * scale_ref[2 * r + 1] + shift_ref[2 * r + 1], 0.0)
        act = conv3x3(y, 2 * r + 1) + skip
    o_ref[0] = act


# --------------------------------------------------------------------------
# Host-side weight / layout transforms
# --------------------------------------------------------------------------
def _banded_conv_weights(w, width):
    # w: (3, 3, Cin, Cout) -> (3, W*Cin, W*Cout) with
    # Wb[ky, j*Cin+ci, j'*Cout+co] = w[ky, j-j'+1, ci, co] if |j-j'| <= 1 else 0
    _, _, cin, cout = w.shape
    j = jnp.arange(width)
    kx = j[:, None] - j[None, :] + 1                     # (j_in, j_out)
    valid = ((kx >= 0) & (kx <= 2)).astype(w.dtype)
    kx_c = jnp.clip(kx, 0, 2)
    wb = w[:, kx_c]                                      # (3, W, W, Cin, Cout)
    wb = wb * valid[None, :, :, None, None]
    wb = jnp.transpose(wb, (0, 1, 3, 2, 4))              # (3, j, Cin, j', Cout)
    return wb.reshape(3, width * cin, width * cout)


def _shift_mats(h):
    # [0]: S[i, i-1] = 1 (shift rows down);  [1]: S[i, i+1] = 1 (shift rows up)
    return jnp.stack([jnp.eye(h, k=-1, dtype=jnp.float32),
                      jnp.eye(h, k=1, dtype=jnp.float32)])


def _bilinear_matrix(out_size, in_size):
    # Row-stochastic interpolation matrix matching
    # torch.nn.functional.interpolate(mode='bilinear', align_corners=False).
    scale = in_size / out_size
    j = jnp.arange(out_size, dtype=jnp.float32)
    src = jnp.maximum((j + 0.5) * scale - 0.5, 0.0)
    x0 = jnp.floor(src)
    lam = src - x0
    x0i = jnp.clip(x0.astype(jnp.int32), 0, in_size - 1)
    x1i = jnp.minimum(x0i + 1, in_size - 1)
    rows = jnp.arange(out_size)
    m = jnp.zeros((out_size, in_size), jnp.float32)
    m = m.at[rows, x0i].add(1.0 - lam)
    m = m.at[rows, x1i].add(lam)
    return m


# --------------------------------------------------------------------------
# pallas_call wrappers
# --------------------------------------------------------------------------
def first_conv(x_rows, wb, bias_row, shifts):
    N, H, wcin = x_rows.shape
    wcout = wb.shape[-1]
    return pl.pallas_call(
        _first_conv_kernel,
        out_shape=jax.ShapeDtypeStruct((N, H, wcout), jnp.float32),
        grid=(N,),
        in_specs=[
            pl.BlockSpec((1, H, wcin), lambda n: (n, 0, 0)),
            pl.BlockSpec((3, wcin, wcout), lambda n: (0, 0, 0)),
            pl.BlockSpec((1, wcout), lambda n: (0, 0)),
            pl.BlockSpec((2, H, H), lambda n: (0, 0, 0)),
        ],
        out_specs=pl.BlockSpec((1, H, wcout), lambda n: (n, 0, 0)),
        compiler_params=pltpu.CompilerParams(
            dimension_semantics=("parallel",)),
    )(x_rows, wb, bias_row, shifts)


def fused_module(x_rows, ah, bw, shifts, scales_t, shifts_t, wbs):
    N, hin, wcin = x_rows.shape
    hout = ah.shape[0]
    wcout = bw.shape[-1]
    L = scales_t.shape[0]
    return pl.pallas_call(
        _module_kernel,
        out_shape=jax.ShapeDtypeStruct((N, hout, wcout), jnp.float32),
        grid=(N,),
        in_specs=[
            pl.BlockSpec((1, hin, wcin), lambda n: (n, 0, 0)),
            pl.BlockSpec((hout, hin), lambda n: (0, 0)),
            pl.BlockSpec((wcin, wcout), lambda n: (0, 0)),
            pl.BlockSpec((2, hout, hout), lambda n: (0, 0, 0)),
            pl.BlockSpec((L, wcout), lambda n: (0, 0)),
            pl.BlockSpec((L, wcout), lambda n: (0, 0)),
            pl.BlockSpec((L, 3, wcout, wcout), lambda n: (0, 0, 0, 0)),
        ],
        out_specs=pl.BlockSpec((1, hout, wcout), lambda n: (n, 0, 0)),
        compiler_params=pltpu.CompilerParams(
            dimension_semantics=("parallel",)),
    )(x_rows, ah, bw, shifts, scales_t, shifts_t, wbs)


# --------------------------------------------------------------------------
# Module forward (parameters + composition)
# --------------------------------------------------------------------------
def init_params(key, ch, num_residuals_f3):
    keys = iter(jax.random.split(key, 4 + 4 * num_residuals_f3 * 2 * 5))

    def nxt():
        return next(keys)

    params = {
        "first_w": 0.1 * jax.random.normal(nxt(), (3, 3, 3, ch), jnp.float32),
        "first_b": 0.1 * jax.random.normal(nxt(), (ch,), jnp.float32),
        "modules": [],
    }
    for _m in range(4):                     # module_2d_1 .. module_2d_4
        res_blocks = []
        for _r in range(num_residuals_f3):  # residual_2d_module
            seqs = []
            for _s in range(2):             # seq1, seq2 = BN -> ReLU -> Conv
                gamma = 1.0 + 0.1 * jax.random.normal(nxt(), (ch,), jnp.float32)
                beta = 0.1 * jax.random.normal(nxt(), (ch,), jnp.float32)
                mean = 0.1 * jax.random.normal(nxt(), (ch,), jnp.float32)
                var = 1.0 + 0.1 * jnp.abs(
                    jax.random.normal(nxt(), (ch,), jnp.float32))
                w = 0.05 * jax.random.normal(nxt(), (3, 3, ch, ch), jnp.float32)
                scale = gamma / jnp.sqrt(var + EPS)
                shift = beta - mean * scale
                seqs.append({"scale": scale, "shift": shift, "w": w})
            res_blocks.append(seqs)
        params["modules"].append(res_blocks)
    return params


def module_2d_forward(tmp_rows, res_blocks, hin, win, hout, wout, ch):
    # Host-side constant-matrix construction (weight/layout transforms only).
    ah = _bilinear_matrix(hout, hin)                            # (Hout, Hin)
    aw = _bilinear_matrix(wout, win)                            # (Wout, Win)
    bw = jnp.kron(aw.T, jnp.eye(ch, dtype=jnp.float32))         # (Win*C, Wout*C)
    shifts = _shift_mats(hout)
    layers = [s for blk in res_blocks for s in blk]             # L = 2*num_res
    scales_t = jnp.stack([jnp.tile(l["scale"], wout) for l in layers])
    shifts_t = jnp.stack([jnp.tile(l["shift"], wout) for l in layers])
    wbs = jnp.stack([_banded_conv_weights(l["w"], wout) for l in layers])
    return fused_module(tmp_rows, ah, bw, shifts, scales_t, shifts_t, wbs)


def descriptors_extraction_forward(params, im_nchw, scales,
                                   prediction_from_scales):
    min_pred = min(prediction_from_scales)
    N, cin, H, W = im_nchw.shape
    ch = params["first_b"].shape[0]

    # first_2d_layer: conv3x3(3 -> ch) + bias
    x_rows = jnp.transpose(im_nchw, (0, 2, 3, 1)).reshape(N, H, W * cin)
    wb_first = _banded_conv_weights(params["first_w"], W)
    bias_row = jnp.tile(params["first_b"], W).reshape(1, W * ch)
    tmp_rows = first_conv(x_rows, wb_first, bias_row, _shift_mats(H))

    out_tensors = []
    for i, sc in enumerate(scales):
        extract = i >= min_pred
        if not extract:
            # torch also computes a downsampled tensor here, but it never
            # reaches the output list, so it is skipped (same outputs).
            out_tensors.append(None)
            continue
        mod_idx = i if i < 4 else 0
        hout, wout = int(sc[1]), int(sc[2])
        out_rows = module_2d_forward(tmp_rows, params["modules"][mod_idx],
                                     H, W, hout, wout, ch)
        out_tensors.append(
            jnp.transpose(out_rows.reshape(N, hout, wout, ch), (0, 3, 1, 2)))
    return out_tensors


# --------------------------------------------------------------------------
# Pure-JAX reference (NHWC) for correctness checking
# --------------------------------------------------------------------------
def _ref_conv3x3(x, w, bias=None):
    out = lax.conv_general_dilated(
        x, w, window_strides=(1, 1), padding=((1, 1), (1, 1)),
        dimension_numbers=("NHWC", "HWIO", "NHWC"),
        precision=lax.Precision.HIGHEST)
    return out if bias is None else out + bias


def _ref_resize(x, hout, wout):
    _, h, w, _ = x.shape
    ah = _bilinear_matrix(hout, h)
    aw = _bilinear_matrix(wout, w)
    return jnp.einsum("ph,qw,nhwc->npqc", ah, aw, x,
                      precision=lax.Precision.HIGHEST)


def _ref_forward(params, im_nchw, scales, prediction_from_scales):
    min_pred = min(prediction_from_scales)
    x = jnp.transpose(im_nchw, (0, 2, 3, 1))
    tmp = _ref_conv3x3(x, params["first_w"], params["first_b"])
    outs = []
    for i, sc in enumerate(scales):
        if i < min_pred:
            outs.append(None)
            continue
        mod_idx = i if i < 4 else 0
        h = _ref_resize(tmp, int(sc[1]), int(sc[2]))
        for blk in params["modules"][mod_idx]:
            skip = h
            for s in blk:
                h = _ref_conv3x3(
                    jnp.maximum(h * s["scale"] + s["shift"], 0.0), s["w"])
            h = h + skip
        outs.append(jnp.transpose(h, (0, 3, 1, 2)))
    return outs


# --------------------------------------------------------------------------
if __name__ == "__main__":
    ch = 8
    num_of_residuals_on_f2 = 1   # unused by the forward pass (as in PyTorch)
    num_of_residuals_on_f3 = 2

    key = jax.random.PRNGKey(0)
    key_params, key_im = jax.random.split(key)
    params = init_params(key_params, ch, num_of_residuals_on_f3)

    N, H, W = 2, 16, 16
    im = jax.random.normal(key_im, (N, 3, H, W), jnp.float32)

    # scales: each entry is (ch, H_target, W_target); sc[1:] is the resize size.
    scales = [(ch, 16, 16), (ch, 8, 8), (ch, 8, 8), (ch, 4, 4)]
    prediction_from_scales = [1, 2, 3]   # min == 1 -> scale 0 yields None

    outs = descriptors_extraction_forward(params, im, scales,
                                          prediction_from_scales)
    refs = _ref_forward(params, im, scales, prediction_from_scales)

    assert outs[0] is None and refs[0] is None
    expected_shapes = [(N, ch, 8, 8), (N, ch, 8, 8), (N, ch, 4, 4)]
    for o, r, es in zip(outs[1:], refs[1:], expected_shapes):
        jax.block_until_ready(o)
        assert o.shape == es, (o.shape, es)
        assert jnp.all(jnp.isfinite(o))
        err = float(jnp.max(jnp.abs(o - r)))
        assert err < 1e-2, f"max abs error vs reference: {err}"

    print("KERNEL_OK")
</pallas_src>

<mosaic_0001>
module attributes {stable_mosaic.version = 11 : i64} {
  func.func @_first_conv_kernel(%arg0: i32, %arg1: memref<1x16x48xf32, #tpu.memory_space<vmem>>, %arg2: memref<3x48x128xf32, #tpu.memory_space<vmem>>, %arg3: memref<1x128xf32, #tpu.memory_space<vmem>>, %arg4: memref<2x16x16xf32, #tpu.memory_space<vmem>>, %arg5: memref<1x16x128xf32, #tpu.memory_space<vmem>>) attributes {dimension_semantics = [#tpu.dimension_semantics<parallel>], iteration_bounds = array<i64: 2>, scalar_prefetch = 0 : i64, scratch_operands = 0 : i64, tpu.core_type = #tpu.core_type<tc>, window_params = [{transform_indices = @transform_0, window_bounds = array<i64: 1, 16, 48>}, {pipeline_mode = #tpu.pipeline_mode<synchronous>, transform_indices = @transform_1, window_bounds = array<i64: 3, 48, 128>}, {pipeline_mode = #tpu.pipeline_mode<synchronous>, transform_indices = @transform_2, window_bounds = array<i64: 1, 128>}, {pipeline_mode = #tpu.pipeline_mode<synchronous>, transform_indices = @transform_3, window_bounds = array<i64: 2, 16, 16>}, {transform_indices = @transform_4, window_bounds = array<i64: 1, 16, 128>}]} {
    %c0 = arith.constant 0 : index
    %c0_0 = arith.constant 0 : index
    %c0_1 = arith.constant 0 : index
    %0 = vector.load %arg1[%c0, %c0_0, %c0_1] : memref<1x16x48xf32, #tpu.memory_space<vmem>>, vector<1x16x48xf32>
    %1 = vector.shape_cast %0 : vector<1x16x48xf32> to vector<16x48xf32>
    %c0_2 = arith.constant 0 : index
    %c0_3 = arith.constant 0 : index
    %c0_4 = arith.constant 0 : index
    %2 = vector.load %arg4[%c0_2, %c0_3, %c0_4] : memref<2x16x16xf32, #tpu.memory_space<vmem>>, vector<1x16x16xf32>
    %3 = vector.shape_cast %2 : vector<1x16x16xf32> to vector<16x16xf32>
    %cst = arith.constant dense<0.000000e+00> : vector<16x48xf32>
    %4 = tpu.matmul %3, %1, %cst {dimension_numbers = #tpu.dot_dimension_numbers<[1], [0], [0], [1], [0, 0, 1, 1], [], []>} : vector<16x16xf32>, vector<16x48xf32>, vector<16x48xf32> -> vector<16x48xf32>
    %c1 = arith.constant 1 : index
    %c0_5 = arith.constant 0 : index
    %c0_6 = arith.constant 0 : index
    %5 = vector.load %arg4[%c1, %c0_5, %c0_6] : memref<2x16x16xf32, #tpu.memory_space<vmem>>, vector<1x16x16xf32>
    %6 = vector.shape_cast %5 : vector<1x16x16xf32> to vector<16x16xf32>
    %cst_7 = arith.constant dense<0.000000e+00> : vector<16x48xf32>
    %7 = tpu.matmul %6, %1, %cst_7 {dimension_numbers = #tpu.dot_dimension_numbers<[1], [0], [0], [1], [0, 0, 1, 1], [], []>} : vector<16x16xf32>, vector<16x48xf32>, vector<16x48xf32> -> vector<16x48xf32>
    %c0_8 = arith.constant 0 : index
    %c0_9 = arith.constant 0 : index
    %c0_10 = arith.constant 0 : index
    %8 = vector.load %arg2[%c0_8, %c0_9, %c0_10] : memref<3x48x128xf32, #tpu.memory_space<vmem>>, vector<1x48x128xf32>
    %9 = vector.shape_cast %8 : vector<1x48x128xf32> to vector<48x128xf32>
    %cst_11 = arith.constant dense<0.000000e+00> : vector<16x128xf32>
    %10 = tpu.matmul %4, %9, %cst_11 {dimension_numbers = #tpu.dot_dimension_numbers<[1], [0], [0], [1], [0, 0, 1, 1], [], []>} : vector<16x48xf32>, vector<48x128xf32>, vector<16x128xf32> -> vector<16x128xf32>
    %c1_12 = arith.constant 1 : index
    %c0_13 = arith.constant 0 : index
    %c0_14 = arith.constant 0 : index
    %11 = vector.load %arg2[%c1_12, %c0_13, %c0_14] : memref<3x48x128xf32, #tpu.memory_space<vmem>>, vector<1x48x128xf32>
    %12 = vector.shape_cast %11 : vector<1x48x128xf32> to vector<48x128xf32>
    %cst_15 = arith.constant dense<0.000000e+00> : vector<16x128xf32>
    %13 = tpu.matmul %1, %12, %cst_15 {dimension_numbers = #tpu.dot_dimension_numbers<[1], [0], [0], [1], [0, 0, 1, 1], [], []>} : vector<16x48xf32>, vector<48x128xf32>, vector<16x128xf32> -> vector<16x128xf32>
    %14 = arith.addf %10, %13 : vector<16x128xf32>
    %c2 = arith.constant 2 : index
    %c0_16 = arith.constant 0 : index
    %c0_17 = arith.constant 0 : index
    %15 = vector.load %arg2[%c2, %c0_16, %c0_17] : memref<3x48x128xf32, #tpu.memory_space<vmem>>, vector<1x48x128xf32>
    %16 = vector.shape_cast %15 : vector<1x48x128xf32> to vector<48x128xf32>
    %cst_18 = arith.constant dense<0.000000e+00> : vector<16x128xf32>
    %17 = tpu.matmul %7, %16, %cst_18 {dimension_numbers = #tpu.dot_dimension_numbers<[1], [0], [0], [1], [0, 0, 1, 1], [], []>} : vector<16x48xf32>, vector<48x128xf32>, vector<16x128xf32> -> vector<16x128xf32>
    %18 = arith.addf %14, %17 : vector<16x128xf32>
    %c0_19 = arith.constant 0 : index
    %c0_20 = arith.constant 0 : index
    %19 = vector.load %arg3[%c0_19, %c0_20] : memref<1x128xf32, #tpu.memory_space<vmem>>, vector<1x128xf32>
    %20 = vector.shape_cast %19 : vector<1x128xf32> to vector<128xf32>
    %21 = vector.shape_cast %20 : vector<128xf32> to vector<1x128xf32>
    %22 = vector.broadcast %21 : vector<1x128xf32> to vector<16x128xf32>
    %23 = arith.addf %18, %22 : vector<16x128xf32>
    %c0_21 = arith.constant 0 : index
    %c0_22 = arith.constant 0 : index
    %c0_23 = arith.constant 0 : index
    %24 = vector.load %arg5[%c0_21, %c0_22, %c0_23] : memref<1x16x128xf32, #tpu.memory_space<vmem>>, vector<1x16x128xf32>
    %25 = vector.shape_cast %24 : vector<1x16x128xf32> to vector<16x128xf32>
    %26 = vector.shape_cast %23 : vector<16x128xf32> to vector<1x16x128xf32>
    tpu.vector_store %arg5[%c0_21, %c0_22, %c0_23], %26 {strides = array<i32>} : memref<1x16x128xf32, #tpu.memory_space<vmem>>, vector<1x16x128xf32>,
    return
  }
  func.func @transform_0(%arg0: i32) -> (i32, i32, i32) {
    %c0_i32 = arith.constant 0 : i32
    %c0_i32_0 = arith.constant 0 : i32
    %c0_i32_1 = arith.constant 0 : i32
    return %arg0, %c0_i32, %c0_i32_0 : i32, i32, i32
  }
  func.func @transform_1(%arg0: i32) -> (i32, i32, i32) {
    %c0_i32 = arith.constant 0 : i32
    %c0_i32_0 = arith.constant 0 : i32
    %c0_i32_1 = arith.constant 0 : i32
    %c0_i32_2 = arith.constant 0 : i32
    return %c0_i32, %c0_i32_0, %c0_i32_1 : i32, i32, i32
  }
  func.func @transform_2(%arg0: i32) -> (i32, i32) {
    %c0_i32 = arith.constant 0 : i32
    %c0_i32_0 = arith.constant 0 : i32
    %c0_i32_1 = arith.constant 0 : i32
    return %c0_i32, %c0_i32_0 : i32, i32
  }
  func.func @transform_3(%arg0: i32) -> (i32, i32, i32) {
    %c0_i32 = arith.constant 0 : i32
    %c0_i32_0 = arith.constant 0 : i32
    %c0_i32_1 = arith.constant 0 : i32
    %c0_i32_2 = arith.constant 0 : i32
    return %c0_i32, %c0_i32_0, %c0_i32_1 : i32, i32, i32
  }
  func.func @transform_4(%arg0: i32) -> (i32, i32, i32) {
    %c0_i32 = arith.constant 0 : i32
    %c0_i32_0 = arith.constant 0 : i32
    %c0_i32_1 = arith.constant 0 : i32
    return %arg0, %c0_i32, %c0_i32_0 : i32, i32, i32
  }
}

</mosaic_0001>

<bundles_post_ra>
// kernel: tpu_custom_call.1
= control target key start
LH: loop header
LB: loop body
LE: loop exit
PB: predicated region body
PF: predicated region fallthrough
CT: control target
= control target key end

     0   :  { %9 = vsyncpa [#allocation3], 0  ;;  %s1490_s0 = inlined_call_operand.hbm [shape: f32[2,16,48], index: 0, kind: input, shape index: {}]   ;;  %s1491_s1 = inlined_call_operand.hbm [shape: f32[3,48,128], index: 1, kind: input, shape index: {}]   ;;  %s1492_s2 = inlined_call_operand.vmem [shape: f32[1,128], index: 2, kind: input, shape index: {}]   ;;  %s1493_s3 = inlined_call_operand.hbm [shape: f32[2,16,16], index: 3, kind: input, shape index: {}]   ;;  %s1494_s4 = inlined_call_operand.hbm [shape: f32[2,16,128], index: 4, kind: output, shape index: {}]  }
   0x1   :  { %11 = vsyncpa [#allocation3 + $0x1], 0 }
   0x2   :  { %12 = vsyncpa [#allocation6], 0 }
   0x3   :  { %13 = vsyncpa [#allocation4], 0 }
   0x4   :  { %15 = vsyncpa [#allocation4 + $0x1], 0  ;;  %s1230_s15 = smov 0   ;;  %s1232_s16 = smov 0  }
   0x5   :  { %s1234_s17 = smov 0   ;;  %s1236_s18 = smov 0  }
   0x6 LB: > { %s1251_s19 = sadd.s32 4294967295, %s1195_s18   ;;  %s798_s20 = sadd.s32 4294967294, %s1195_s18   ;;  %s1195_s18 = sphi %s1236_s18, %s1514_s18   ;;  %s1191_s17 = sphi %s1234_s17, %s1513_s17   ;;  %s1187_s16 = sphi %s1232_s16, %s1512_s16   ;;  %s1183_s15 = sphi %s1230_s15, %s1511_s15  }
   0x7   : > { %p41_p0 = scmp.ne.s32.totalorder %s1187_s16, %s1183_s15  ;;  %p1495_p1 = scmp.eq.s32.totalorder %s1251_s19, 0 }
   0x8   : > { %p134_p3 = scmp.eq.s32.totalorder %s798_s20, 1  ;;  %p799_p5 = scmp.ge.s32.totalorder %s1195_s18, 1 }
   0x9   : > { %p1260_p4 = por %p1495_p1, %p41_p0  ;;  %p141_p7 = scmp.lt.s32.totalorder %s1195_s18, 3 }
   0xa   : > { %p1265_p6 = por %p134_p3, %p41_p0  ;;  %s1197_s24 = smov [#allocation5]  }
   0xb   : > { %s1498_s21 = scalar_select %p1260_p4, 1, 0 }
   0xc   : > { %s1499_s22 = scalar_select %p1265_p6, 1, 0 }
   0xd   : > { %p1270_p8 = pnand %p799_p5, %p141_p7  ;;  %s153_s25 = sshll.u32 %s1197_s24, 4  ;;  %s1274_s25 = int_to_ptr.vmem [resolvable:$true] %s153_s25 }
   0xe   : > { %s1198_s27 = smov [#allocation7]   ;;  %s1039_s5 = scalar_lea.hbm %s1491_s1, 2304 }
   0xf   : > { %p980_p9 = pneg %p1270_p8  ;;  %s169_s28 = sshll.u32 %s1198_s27, 4  ;;  %s1285_s28 = int_to_ptr.vmem [resolvable:$true] %s169_s28 }
  0x10   : > { %p1040_p12 = scmp.ne.s32.totalorder %s1491_s1, %s1039_s5  ;;  %p1046_p5 = scmp.lt.u32.totalorder %s1039_s5, %s1491_s1 }
  0x11   : > { %p1281_p11 = pnand %p980_p9, %p1495_p1 }
  0x13   : > { %p1041_p13 = pneg %p1281_p11 }
  0x15   : > { %p1042_p0 = pnand %p1041_p13, %p1040_p12 }
  0x17   : > { %p1043_p3 = pneg %p1042_p0 }
  0x19   : > { %p1048_p7 = pnand %p1046_p5, %p1043_p3 }
  0x1b   : > { %1051 = shalt.err (!%p1048_p7)
}
  0x1c   : > { %s1052_s10 = scalar_lea.vmem %s1274_s25, 2304  ;;  %p1060_p2 = scmp.lt.s32.totalorder %s1274_s25, %s1274_s25 }
  0x1d   : > { %p1053_p9 = scmp.ne.s32.totalorder %s1274_s25, %s1052_s10  ;;  %p1061_p12 = scmp.lt.s32.totalorder %s1052_s10, %s1052_s10 }
  0x1f   : > { %p1055_p10 = pnand %p1053_p9, %p1041_p13  ;;  %p1062_p0 = por %p1061_p12, %p1060_p2 }
  0x21   : > { %p1056_p1 = pneg %p1055_p10 }
  0x23   : > { %p1063_p6 = pnand %p1062_p0, %p1056_p1 }
  0x25   : > { %1066 = shalt.err (!%p1063_p6)
}
  0x26   : > { %s1199_s11 = smov 128   ;;  %s1200_s12 = smov 8  }
  0x27   : > { %983 = dma.hbm_to_vmem [thread:$0]  (!%p1281_p11), %s1491_s1, 2304, %s1274_s25, [#allocation6], %s1199_s11, %s1199_s11, %s1200_s12  }
  0x28   : > { %s1067_s27 = scalar_lea.hbm %s1493_s3, 512 }
  0x29   : > { %p1068_p1 = scmp.ne.s32.totalorder %s1493_s3, %s1067_s27  ;;  %p1074_p10 = scmp.lt.u32.totalorder %s1067_s27, %s1493_s3 }
  0x2b   : > { %p1070_p2 = pnand %p1068_p1, %p1041_p13 }
  0x2d   : > { %p1071_p6 = pneg %p1070_p2 }
  0x2f   : > { %p1076_p3 = pnand %p1074_p10, %p1071_p6 }
  0x31   : > { %1079 = shalt.err (!%p1076_p3)
}
  0x32   : > { %s1080_s25 = scalar_lea.vmem %s1285_s28, 512  ;;  %p1088_p12 = scmp.lt.s32.totalorder %s1285_s28, %s1285_s28 }
  0x33   : > { %p1081_p5 = scmp.ne.s32.totalorder %s1285_s28, %s1080_s25  ;;  %p1089_p0 = scmp.lt.s32.totalorder %s1080_s25, %s1080_s25 }
  0x35   : > { %p1083_p7 = pnand %p1081_p5, %p1041_p13  ;;  %p1090_p1 = por %p1089_p0, %p1088_p12 }
  0x37   : > { %p1084_p9 = pneg %p1083_p7 }
  0x39   : > { %p1091_p2 = pnand %p1090_p1, %p1084_p9 }
  0x3b   : > { %1094 = shalt.err (!%p1091_p2)
}
  0x3c   : > { %986 = dma.hbm_to_vmem [thread:$0]  (!%p1281_p11), %s1493_s3, 512, %s1285_s28, [#allocation6], %s1199_s11, %s1199_s11, %s1200_s12  }
  0x3d   : > { %s1346_s26 = sadd.s32 1, %s1195_s18   ;;  %s28_s9 = sadd.s32 1, %s1191_s17 }
  0x3e   : > { %s25_s10 = ssub.s32 %s1195_s18, %s1346_s26  ;;  %p35_p13 = scmp.ne.s32.totalorder %s1191_s17, %s1187_s16 }
  0x3f   : > { %p26_p6 = scmp.eq.s32.totalorder %s25_s10, 0  ;;  %p36_p10 = scmp.eq.s32.totalorder %s1195_s18, 0 }
  0x40   : > { %p1502_p3 = scmp.eq.s32.totalorder %s1251_s19, 1  ;;  %p997_p7 = scmp.lt.s32.totalorder %s1195_s18, 2 }
  0x41   : > { %s1362_s14 = scalar_select %p26_p6, %s1191_s17, %s28_s9  }
  0x42   : > { %p1356_p5 = por %p1502_p3, %p35_p13  ;;  %p37_p9 = por %p36_p10, %p35_p13 }
  0x43   : > { %s183_s20 = sand.u32 1, %s1191_s17   ;;  %s827_s28 = sshll.u32 %s1195_s18, 8 }
  0x44   : > { %s1503_s13 = scalar_select %p1356_p5, 1, 0 }
  0x45   : > { %s803_s24 = sshll.u32 %s183_s20, 4  ;;  %s1369_s30 = scalar_lea.hbm %s1490_s0, %s827_s28 }
  0x46   : > { %s187_s5 = scalar_lea.vmem [#allocation2], %s803_s24  ;;  %p1373_p11 = pnand %p997_p7, %p37_p9 }
  0x47   : > { %s194_s6 = sshll.u32 %s187_s5, 4  ;;  %s1377_s7 = scalar_lea.sflag [#allocation3], %s183_s20  ;;  %s1371_s6 = int_to_ptr.vmem [resolvable:$true] %s194_s6 }
  0x48   : > { %s1095_s8 = scalar_lea.hbm %s1369_s30, 256  ;;  %p1097_p0 = pneg %p1373_p11 }
  0x49   : > { %p1096_p12 = scmp.ne.s32.totalorder %s1369_s30, %s1095_s8  ;;  %s1100_s24 = scalar_lea.hbm %s1490_s0, 512 }
  0x4a   : > { %p1101_p13 = scmp.lt.u32.totalorder %s1369_s30, %s1490_s0  ;;  %p1102_p6 = scmp.lt.u32.totalorder %s1100_s24, %s1095_s8 }
  0x4b   : > { %p1098_p1 = pnand %p1097_p0, %p1096_p12  ;;  %p1104_p3 = scmp.lt.u32.totalorder %s1095_s8, %s1369_s30 }
  0x4c   : > { %p1103_p10 = por %p1102_p6, %p1101_p13 }
  0x4d   : > { %p1099_p2 = pneg %p1098_p1 }
  0x4e   : > { %p1105_p7 = por %p1104_p3, %p1103_p10 }
  0x50   : > { %p1106_p9 = pnand %p1105_p7, %p1099_p2 }
  0x52   : > { %1109 = shalt.err (!%p1106_p9)
}
  0x53   : > { %s1110_s20 = scalar_lea.vmem %s1371_s6, 256  ;;  %s1201_s29 = smov [#allocation2]  }
  0x54   : > { %p1111_p12 = scmp.ne.s32.totalorder %s1371_s6, %s1110_s20  ;;  %s1115_s5 = sshll.u32 %s1201_s29, 4  ;;  %s1116_s5 = int_to_ptr.vmem [resolvable:$false] %s1115_s5 }
  0x55   : > { %s1117_s9 = scalar_lea.vmem %s1116_s5, 512  ;;  %p1118_p4 = scmp.lt.s32.totalorder %s1371_s6, %s1116_s5 }
  0x56   : > { %p1113_p1 = pnand %p1111_p12, %p1097_p0  ;;  %p1119_p13 = scmp.lt.s32.totalorder %s1117_s9, %s1110_s20 }
  0x58   : > { %p1114_p5 = pneg %p1113_p1  ;;  %p1120_p6 = por %p1119_p13, %p1118_p4 }
  0x5a   : > { %p1121_p10 = pnand %p1120_p6, %p1114_p5 }
  0x5c   : > { %1124 = shalt.err (!%p1121_p10)
}
  0x5d   : > { %990 = dma.hbm_to_vmem [thread:$0]  (!%p1373_p11), %s1369_s30, 256, %s1371_s6, %s1377_s7, %s1199_s11, %s1199_s11, %s1200_s12  }
  0x5e   : > { %206 = sbr.rel (%p1270_p8) target bundleno = 570 (0x23a), region = 36  ;;  %s1411_s8 = sand.u32 (!%p1270_p8), 1, %s1187_s16  }
  0x5f   : > { %s807_s10 = sshll.u32 (!%p1270_p8), %s1411_s8, 4  ;;  %s209_s24 = scalar_lea.sflag (!%p1270_p8), [#allocation3], %s1411_s8 }
  0x60   : > { %s212_s25 = scalar_lea.vmem (!%p1270_p8), [#allocation2], %s807_s10  ;;  %p1505_p4 = scmp.ne.s32.totalorder (!%p1270_p8), %s1498_s21, 0 }
  0x65   : > { %1170 = dma.done.wait (%p1505_p4), %s209_s24, 256  }
  0x66   : > { %1172 = vsyncadd (%p1505_p4), %s209_s24, 4294967040  ;;  %p1506_p5 = scmp.eq.s32.totalorder %s1251_s19, 0 }
  0x68   : > { %1174 = dma.done.wait (%p1506_p5), [#allocation6], 2816   ;;  %p1507_p8 = pmov %p1506_p5 }
  0x69   : > { %vm249_vm0 = vcmask 130048   ;;  %v245_v0 = vld [vmem:[%s212_s25] sm:$0xff]  ;;  %v246_v1 = vld [vmem:[%s212_s25 + $0x8] sm:$0xff]  ;;  %vm428_vm1 = vcmask 392192   ;;  %s244_s21 = scalar_lea.vmem [#allocation8], %s807_s10  ;;  %s828_s30 = sshll.u32 %s1251_s19, 8 }
  0x6a   : > { %1176 = vsyncadd (%p1507_p8), [#allocation6], 4294964480  ;;  %v247_v2 = vld [vmem:[#allocation7] sm:$0xff]  ;;  %v920_v3 = vpack.c.bf16 %v246_v1, %v245_v0  ;;  %v415_v4 = vld [vmem:[#allocation5] sm:$0xff]  ;;  %s706_s23 = sshll.u32 %s244_s21, 4  ;;  %s1446_s28 = scalar_lea.hbm %s1494_s4, %s828_s30  ;;  %s1441_s23 = int_to_ptr.vmem [resolvable:$true] %s706_s23 }
  0x6b   : > { %865 = vmatprep.mubr.msk.f32.mxu1 %vm249_vm0, %v247_v2  ;;  %v416_v5 = vld [vmem:[#allocation5 + $0x8] sm:$0xff]  ;;  %v417_v6 = vld [vmem:[#allocation5 + $0x10] sm:$0xff]  ;;  %v418_v8 = vld [vmem:[#allocation5 + $0x18] sm:$0xff]  ;;  %s693_s27 = scalar_lea.sflag [#allocation4], %s1411_s8  ;;  %s1125_s20 = scalar_lea.vmem %s1441_s23, 256 }
  0x6c   : > { %921 = vmatprep.subr.bf16.mxu1 %v920_v3  ;;  %v940_v7 = vpack.c.bf16 %v416_v5, %v415_v4  ;;  %v248_v9 = vld [vmem:[#allocation7 + $0x8] sm:$0xff]  ;;  %v944_v10 = vpack.c.bf16 %v418_v8, %v417_v6  ;;  %v419_v11 = vld [vmem:[#allocation5 + $0x20] sm:$0xff]  ;;  %v420_v12 = vld [vmem:[#allocation5 + $0x28] sm:$0xff]  ;;  %p1126_p11 = scmp.ne.s32.totalorder %s1441_s23, %s1125_s20  ;;  %p1508_p0 = scmp.ne.s32.totalorder %s1503_s13, 0 }
  0x6d   : > { %923 = vmatpush3.bf16.msra.mxu1 %v920_v3  ;;  %v332_v13 = vld [vmem:[#allocation7 + $0x10] sm:$0xff]  ;;  %v948_v14 = vpack.c.bf16 %v420_v12, %v419_v11  ;;  %v333_v15 = vld [vmem:[#allocation7 + $0x18] sm:$0xff]  ;;  %v422_v16 = vld [vmem:[#allocation5 + $0x30] sm:$0xff]  ;;  %s1202_s19 = smov [#allocation8]  }
  0x6e   : > { %925 = vmatprep.subr.bf16.mxu1 %v920_v3  ;;  %941 = vmatprep.subr.bf16.mxu0 %v940_v7  ;;  %v423_v17 = vld [vmem:[#allocation5 + $0x38] sm:$0xff]  ;;  %v592_v19 = vld [vmem:[#allocation5 + $0x60] sm:$0xff]  ;;  %v593_v20 = vld [vmem:[#allocation5 + $0x68] sm:$0xff]  ;;  %p1127_p2 = pnand %p1126_p11, %p1508_p0  ;;  %s1129_s29 = sshll.u32 %s1202_s19, 4  ;;  %s1130_s29 = int_to_ptr.vmem [resolvable:$false] %s1129_s29 }
  0x6f   : > { %943 = vmatpush3.bf16.msra.mxu0 %v940_v7  ;;  %v928_v18 = vpack.c.bf16 %v423_v17, %v422_v16  ;;  %v952_v21 = vpack.c.bf16 %v593_v20, %v592_v19  ;;  %v424_v22 = vld [vmem:[#allocation5 + $0x40] sm:$0xff]  ;;  %v425_v23 = vld [vmem:[#allocation5 + $0x48] sm:$0xff]  ;;  %v426_v25 = vld [vmem:[#allocation5 + $0x50] sm:$0xff]  ;;  %s1131_s5 = scalar_lea.vmem %s1130_s29, 512  ;;  %p1132_p7 = scmp.lt.s32.totalorder %s1441_s23, %s1130_s29 }
  0x70   : > { %866 = vmatmul.mubr.msk.f32.vlgmr.msra.gmra.mrb[0].mxu1 %vm249_vm0, %v248_v9  ;;  %945 = vmatprep.subr.bf16.mxu0 %v944_v10  ;;  %v932_v24 = vpack.c.bf16 %v425_v23, %v424_v22  ;;  %v427_v26 = vld [vmem:[#allocation5 + $0x58] sm:$0xff]  ;;  %v594_v28 = vld [vmem:[#allocation5 + $0x70] sm:$0xff]  ;;  %v596_v33 = vld [vmem:[#allocation5 + $0x80] sm:$0xff]  ;;  %p1128_p3 = pneg %p1127_p2  ;;  %p1133_p9 = scmp.lt.s32.totalorder %s1131_s5, %s1125_s20 }
  0x71   : > { %927 = vmatpush3.bf16.msra.mxu1 %v920_v3  ;;  %872 = vmatprep.mubr.msk.f32.mxu1 %vm249_vm0, %v332_v13  ;;  %v936_v27 = vpack.c.bf16 %v427_v26, %v426_v25  ;;  %v595_v29 = vld [vmem:[#allocation5 + $0x78] sm:$0xff]  ;;  %v597_v34 = vld [vmem:[#allocation5 + $0x88] sm:$0xff]  ;;  %v821_v41 = vld [vmem:[%s1492_s2] ss:$0 sm:$0xff] }
  0x72   : > { %929 = vmatprep.subr.bf16.mxu1 %v928_v18  ;;  %v956_v32 = vpack.c.bf16 %v595_v29, %v594_v28  ;;  %v960_v36 = vpack.c.bf16 %v597_v34, %v596_v33  ;;  %p1134_p12 = por %p1133_p9, %p1132_p7 }
  0x73   : > { %947 = vmatpush3.bf16.msra.mxu0 %v944_v10 }
  0x74   : > { %873 = vmatmul.mubr.msk.f32.vlgmr.msra.gmra.mrb[2].mxu1 %vm249_vm0, %v333_v15  ;;  %949 = vmatprep.subr.bf16.mxu0 %v948_v14  ;;  %p1135_p1 = pnand %p1134_p12, %p1128_p3 }
  0x75   : > { %931 = vmatpush3.bf16.msra.mxu1 %v928_v18  ;;  %887 = vmatprep.mubr.msk.f32.mxu1 %vm428_vm1, %v245_v0 }
  0x76   : > { %933 = vmatprep.subr.bf16.mxu1 %v932_v24 }
  0x77   : > { %951 = vmatpush3.bf16.msra.mxu0 %v948_v14 }
  0x78   : > { %953 = vmatprep.subr.bf16.mxu0 %v952_v21 }
  0x79   : > { %935 = vmatpush3.bf16.msra.mxu1 %v932_v24 }
  0x7a   : > { %937 = vmatprep.subr.bf16.mxu1 %v936_v27 }
  0x7d   : > { %939 = vmatpush3.bf16.msra.mxu1 %v936_v27 }
  0x80   : > { %888 = vmatmul.mubr.msk.f32.vlgmr.msra.gmra.mrb[4].mxu1 %vm428_vm1, %v246_v1 }
 0x143   : > { %v867_v30 = vpop.f32.mrb[0].mxu1 }
 0x144   : > { %v322_v31 = vpop.f32.mrb[1].mxu1 }
 0x145   : > { %902 = vmatprep.mubr.msk.f32.mxu0 %vm428_vm1, %v322_v31 }
 0x146   : > { %903 = vmatmul.mubr.msk.f32.vlgmr.msra.gmra.mrb[0].mxu0 %vm428_vm1, %v867_v30 }
 0x147   : > { %955 = vmatpush3.bf16.msra.mxu0 %v952_v21  ;;  %v874_v35 = vpop.f32.mrb[2].mxu1 }
 0x148   : > { %957 = vmatprep.subr.bf16.mxu0 %v956_v32  ;;  %v406_v37 = vpop.f32.mrb[3].mxu1 }
 0x149   : > { %917 = vmatprep.mubr.msk.f32.mxu0 %vm428_vm1, %v406_v37 }
 0x14b   : > { %959 = vmatpush3.bf16.msra.mxu0 %v956_v32 }
 0x14c   : > { %961 = vmatprep.subr.bf16.mxu0 %v960_v36 }
 0x14f   : > { %963 = vmatpush3.bf16.msra.mxu0 %v960_v36 }
 0x152   : > { %918 = vmatmul.mubr.msk.f32.vlgmr.msra.gmra.mrb[0].mxu0 %vm428_vm1, %v874_v35 }
 0x153   : > { %v889_v38 = vpop.f32.mrb[4].mxu1 }
 0x154   : > { %v501_v39 = vpop.f32.mrb[5].mxu1 }
 0x225   : > { %v919_v40 = vpop.f32.mrb[0].mxu0 }
 0x226   : > { %v964_v42 = vadd.f32 %v919_v40, %v889_v38  ;;  %v670_v43 = vpop.f32.mrb[1].mxu0 }
 0x227   : > { %v965_v44 = vadd.f32 %v670_v43, %v501_v39 }
 0x228   : > { %v689_v45 = vadd.f32 %v964_v42, %v821_v41 }
 0x229   : > { %v688_v46 = vadd.f32 %v965_v44, %v821_v41 }
 0x22a   : > { %691 = vst [vmem:[%s244_s21 + $0x8] sm:$0xff] %v689_v45 }
 0x22b   : > { %690 = vst [vmem:[%s244_s21] sm:$0xff] %v688_v46 }
 0x22c   : > { %1138 = shalt.err (!%p1135_p1)
}
 0x22d   : > { %s1139_s9 = scalar_lea.hbm %s1446_s28, 256  ;;  %s1143_s25 = scalar_lea.hbm %s1494_s4, 512 }
 0x22e   : > { %p1140_p13 = scmp.ne.s32.totalorder %s1446_s28, %s1139_s9  ;;  %p1144_p4 = scmp.lt.u32.totalorder %s1446_s28, %s1494_s4 }
 0x22f   : > { %p1145_p5 = scmp.lt.u32.totalorder %s1143_s25, %s1139_s9  ;;  %p1147_p11 = scmp.lt.u32.totalorder %s1139_s9, %s1446_s28 }
 0x230   : > { %p1141_p6 = pnand %p1140_p13, %p1508_p0 }
 0x231   : > { %p1146_p8 = por %p1145_p5, %p1144_p4 }
 0x232   : > { %p1142_p10 = pneg %p1141_p6 }
 0x233   : > { %p1148_p2 = por %p1147_p11, %p1146_p8 }
 0x235   : > { %p1149_p3 = pnand %p1148_p2, %p1142_p10 }
 0x237   : > { %1152 = shalt.err (!%p1149_p3)
}
 0x238   : > { %s1203_s12 = smov 128   ;;  %s1204_s30 = smov 8  }
 0x239   : > { %978 = dma.vmem_to_hbm [thread:$0]  (%p1508_p0), %s1441_s23, 256, %s1446_s28, %s693_s27, %s1203_s12, %s1203_s12, %s1204_s30  }
 0x23a PF: > { %s721_s6 = sand.u32 1, %s1183_s15   ;;  %p1509_p7 = scmp.ne.s32.totalorder %s1499_s22, 0 }
 0x23b   : > { %p1510_p9 = scmp.ge.s32.totalorder %s1195_s18, 2  ;;  %s722_s7 = scalar_lea.sflag [#allocation4], %s721_s6 }
 0x23d   : > { %p992_p12 = pnand %p1510_p9, %p1509_p7 }
 0x23f   : > { %1178 = dma.done.wait (!%p992_p12), %s722_s7, 256  }
 0x240   : > { %1180 = vsyncadd (!%p992_p12), %s722_s7, 4294967040  ;;  %p18_p1 = scmp.ge.s32.totalorder %s1346_s26, 4   ;;  %s1511_s15 = smov %s1187_s16 }
 0x241   : > { %s1512_s16 = smov %s1191_s17  ;;  %s1513_s17 = smov %s1362_s14 }
 0x242   : > { %s1514_s18 = smov %s1346_s26  ;;  %20 = sbr.rel (!%p18_p1) target bundleno = 6 (0x6), region = 92 }
 0x249   :  { %727 = vsyncpa [#allocation3], 1 }
 0x24a   :  { %729 = vsyncpa [#allocation3 + $0x1], 1 }
 0x24b   :  { %730 = vsyncpa [#allocation6], 1 }
 0x24c   :  { %731 = vsyncpa [#allocation4], 1 }
 0x24d   :  { %733 = vsyncpa [#allocation4 + $0x1], 1 }

</bundles_post_ra>
